<compile_context>
chip_gen: v6e
topology: v6e:2x2x1
jax: 0.10.0
libtpu: 0.0.40
codegen_flags: <defaults>
</compile_context>

<pallas_src>
import functools

import jax
import jax.numpy as jnp
from jax.experimental import pallas as pl
from jax.experimental.pallas import tpu as pltpu


def _round_up(n, m):
    return ((n + m - 1) // m) * m


# ----------------------------------------------------------------------------
# Fused kernel: runs once per (batch element, object step)
# ----------------------------------------------------------------------------
def _fused_rnn_kernel(x_ref, emb_d_ref, emb_m_ref, mask_d_ref, mask_m_ref,
                      d_w1_ref, d_w2_ref, d_b2_ref,
                      m_w1_ref, m_w2_ref, m_b2_ref,
                      out_ref, state_ref, hd_ref, *, H, W):
    # x_ref:      (1, Cin_d_pad, H*W)   input image (channel-padded), lanes = pixels
    # emb_*_ref:  (1, 1, Cmid, 1)       per-(b, step) conditioning emb (+conv bias)
    # mask_*_ref: (9*Cin_pad, H*W)      zero-padding validity mask per tap/channel
    # *_w1_ref:   (Cmid, 9*Cin_pad)     flattened 3x3 conv weights (bf16)
    # *_w2_ref:   (Cout, Cmid)          1x1 conv weights (bf16)
    # *_b2_ref:   (Cout, 1)             f32 bias
    # out_ref:    (1, 3, H*W)           ret for this batch element
    # state_ref:  (C_state_pad, H*W)    VMEM carry [ret; hidden; pad] across c axis
    # hd_ref:     (Cmid_d, H*W)         cached diff-conv linear output (x-only)
    HW = H * W
    # Static lane-shift per 3x3 tap: output pixel p reads input pixel p + offset.
    shifts = [(-((dy - 1) * W + (dx - 1))) % HW
              for dy in range(3) for dx in range(3)]

    def conv3x3(xin, w_ref, m_ref):
        # xin: (Cin_pad, HW) f32 -> (Cmid, HW) f32 via one MXU matmul.
        cols = jnp.concatenate(
            [xin if s == 0 else pltpu.roll(xin, shift=s, axis=1) for s in shifts],
            axis=0)                                            # (9*Cin_pad, HW)
        cols = (cols * m_ref[...]).astype(jnp.bfloat16)        # zero-padding mask
        return jnp.dot(w_ref[...], cols, preferred_element_type=jnp.float32)

    @pl.when(pl.program_id(1) == 0)
    def _():
        state_ref[...] = jnp.zeros_like(state_ref)
        # diff-conv depends only on x -> hoist out of the c loop.
        hd_ref[...] = conv3x3(x_ref[0], d_w1_ref, mask_d_ref)

    # --- diff_model.unet stub: (cached 3x3 conv) -> +emb -> SiLU -> 1x1 conv ---
    h_d = hd_ref[...] + emb_d_ref[0, 0]                        # (Cmid_d, HW)
    h_d = h_d * jax.nn.sigmoid(h_d)                            # SiLU (VPU + EUP)
    output = jnp.dot(d_w2_ref[...], h_d.astype(jnp.bfloat16),
                     preferred_element_type=jnp.float32) + d_b2_ref[...]  # (3, HW)

    # --- UNetModel stub on cat([output, ret, hidden]) ---
    cat = jnp.concatenate([output, state_ref[...]], axis=0)    # (Cin_m_pad, HW)
    h_m = conv3x3(cat, m_w1_ref, mask_m_ref) + emb_m_ref[0, 0]  # (Cmid_m, HW)
    h_m = h_m * jax.nn.sigmoid(h_m)
    new_state = jnp.dot(m_w2_ref[...], h_m.astype(jnp.bfloat16),
                        preferred_element_type=jnp.float32) + m_b2_ref[...]

    state_ref[...] = new_state                                  # carry in VMEM

    @pl.when(pl.program_id(1) == pl.num_programs(1) - 1)
    def _():
        out_ref[0] = new_state[:3]                              # lane-dense write


# ----------------------------------------------------------------------------
# Conditioning / parameters (deterministic, in-script)
# ----------------------------------------------------------------------------
def timestep_embedding(t, dim):
    half = dim // 2
    freqs = jnp.exp(-jnp.log(10000.0) * jnp.arange(half, dtype=jnp.float32) / half)
    args = t.astype(jnp.float32)[:, None] * freqs[None, :]
    return jnp.concatenate([jnp.cos(args), jnp.sin(args)], axis=-1)  # (B, dim)


def init_params(key, *, y_dim, hidden_channels, image_size, temb_dim, diff_mid):
    keys = jax.random.split(key, 8)
    s = 0.1
    rnn_in = 6 + hidden_channels
    rnn_mid = image_size * 2                      # model_channels = image_size * 2
    rnn_out = 3 + hidden_channels
    return {
        # diff_model.unet stub: 3 -> diff_mid -> 3
        "d_w1": s * jax.random.normal(keys[0], (9, diff_mid, 3), jnp.float32),
        "d_b1": jnp.zeros((diff_mid,), jnp.float32),
        "d_w2": s * jax.random.normal(keys[1], (3, diff_mid), jnp.float32),
        "d_b2": jnp.zeros((3, 1), jnp.float32),
        "d_temb": s * jax.random.normal(keys[2], (temb_dim, diff_mid), jnp.float32),
        "d_yemb": s * jax.random.normal(keys[3], (y_dim, diff_mid), jnp.float32),
        # UNetModel stub: (6 + hidden) -> image_size*2 -> (3 + hidden)
        "m_w1": s * jax.random.normal(keys[4], (9, rnn_mid, rnn_in), jnp.float32),
        "m_b1": jnp.zeros((rnn_mid,), jnp.float32),
        "m_w2": s * jax.random.normal(keys[5], (rnn_out, rnn_mid), jnp.float32),
        "m_b2": jnp.zeros((rnn_out, 1), jnp.float32),
        "m_temb": s * jax.random.normal(keys[6], (temb_dim, rnn_mid), jnp.float32),
        "m_yemb": s * jax.random.normal(keys[7], (y_dim, rnn_mid), jnp.float32),
    }


def _make_tap_masks(H, W):
    """(9, H*W) f32 validity masks for a 3x3 conv with zero padding=1."""
    p = jnp.arange(H * W)
    row, col = p // W, p % W
    masks = []
    for dy in range(3):
        for dx in range(3):
            ry, rx = row + (dy - 1), col + (dx - 1)
            m = ((ry >= 0) & (ry < H) & (rx >= 0) & (rx < W)).astype(jnp.float32)
            masks.append(m)
    return jnp.stack(masks, axis=0)


def _flatten_conv_w(w, cin_pad):
    """(9, Cmid, Cin) -> (Cmid, 9*cin_pad) with zero-padded channel columns."""
    nine, cmid, cin = w.shape
    wp = jnp.zeros((nine, cmid, cin_pad), w.dtype).at[:, :, :cin].set(w)
    return jnp.transpose(wp, (1, 0, 2)).reshape(cmid, nine * cin_pad)


# ----------------------------------------------------------------------------
# RNNDevil.forward
# ----------------------------------------------------------------------------
def rnn_devil_forward(params, x, t, y, mask, *, image_size, hidden_channels,
                      temb_dim):
    """
    x:    (B, 3, H, W)  NCHW
    t:    (B,)          timesteps
    y:    (B, c, y_dim) per-object conditioning vectors
    mask: (B, c)        per-object gate
    returns (B, 3, H, W) NCHW
    """
    B, c = y.shape[0], y.shape[1]
    H = W = image_size
    HW = H * W

    Cmid_d = params["d_w1"].shape[1]
    Cmid_m = params["m_w1"].shape[1]
    C_state = 3 + hidden_channels
    Cin_d_pad = _round_up(3, 8)
    Cin_m_pad = _round_up(6 + hidden_channels, 8)
    C_state_pad = Cin_m_pad - 3          # padded ret+hidden rows carried in VMEM

    # NCHW is channels-first already: flatten spatial (lane-dense) + pad channels.
    x_flat = x.reshape(B, 3, HW).astype(jnp.float32)
    x_pad = jnp.pad(x_flat, ((0, 0), (0, Cin_d_pad - 3), (0, 0)))

    # Precompute conditioning embeddings (conv bias b1 folded in) for all (B, c).
    # TODO(synk): mask[:, i] is a scalar gate on the embedding here; the original
    # UNetModel consumes it via cross-attention.
    t_feat = timestep_embedding(t, temb_dim)                        # (B, temb)
    y_gated = y.astype(jnp.float32) * mask.astype(jnp.float32)[..., None]
    emb_d = ((t_feat @ params["d_temb"])[:, None, :]
             + jnp.einsum("bcy,ym->bcm", y_gated, params["d_yemb"])
             + params["d_b1"][None, None, :])[..., None]            # (B,c,Cmid_d,1)
    emb_m = ((t_feat @ params["m_temb"])[:, None, :]
             + jnp.einsum("bcy,ym->bcm", y_gated, params["m_yemb"])
             + params["m_b1"][None, None, :])[..., None]            # (B,c,Cmid_m,1)

    tap = _make_tap_masks(H, W)                                     # (9, HW)
    mask_d = jnp.repeat(tap, Cin_d_pad, axis=0)                     # (9*Cin_d_pad, HW)
    mask_m = jnp.repeat(tap, Cin_m_pad, axis=0)                     # (9*Cin_m_pad, HW)

    # Flatten / pad / pre-cast weights so the kernel does zero weight prep.
    d_w1f = _flatten_conv_w(params["d_w1"], Cin_d_pad).astype(jnp.bfloat16)
    m_w1f = _flatten_conv_w(params["m_w1"], Cin_m_pad).astype(jnp.bfloat16)
    d_w2 = params["d_w2"].astype(jnp.bfloat16)                      # (3, Cmid_d)
    m_w2p = jnp.pad(params["m_w2"],
                    ((0, C_state_pad - C_state), (0, 0))).astype(jnp.bfloat16)
    d_b2 = params["d_b2"].astype(jnp.float32)                       # (3, 1)
    m_b2p = jnp.pad(params["m_b2"],
                    ((0, C_state_pad - C_state), (0, 0))).astype(jnp.float32)

    kernel = functools.partial(_fused_rnn_kernel, H=H, W=W)
    out = pl.pallas_call(
        kernel,
        out_shape=jax.ShapeDtypeStruct((B, 3, HW), jnp.float32),
        grid=(B, c),
        in_specs=[
            pl.BlockSpec((1, Cin_d_pad, HW), lambda b, i: (b, 0, 0)),     # x
            pl.BlockSpec((1, 1, Cmid_d, 1), lambda b, i: (b, i, 0, 0)),   # emb_d
            pl.BlockSpec((1, 1, Cmid_m, 1), lambda b, i: (b, i, 0, 0)),   # emb_m
            pl.BlockSpec((9 * Cin_d_pad, HW), lambda b, i: (0, 0)),       # mask_d
            pl.BlockSpec((9 * Cin_m_pad, HW), lambda b, i: (0, 0)),       # mask_m
            pl.BlockSpec((Cmid_d, 9 * Cin_d_pad), lambda b, i: (0, 0)),   # d_w1
            pl.BlockSpec((3, Cmid_d), lambda b, i: (0, 0)),               # d_w2
            pl.BlockSpec((3, 1), lambda b, i: (0, 0)),                    # d_b2
            pl.BlockSpec((Cmid_m, 9 * Cin_m_pad), lambda b, i: (0, 0)),   # m_w1
            pl.BlockSpec((C_state_pad, Cmid_m), lambda b, i: (0, 0)),     # m_w2
            pl.BlockSpec((C_state_pad, 1), lambda b, i: (0, 0)),          # m_b2
        ],
        out_specs=pl.BlockSpec((1, 3, HW), lambda b, i: (b, 0, 0)),
        scratch_shapes=[pltpu.VMEM((C_state_pad, HW), jnp.float32),   # ret+hidden
                        pltpu.VMEM((Cmid_d, HW), jnp.float32)],       # cached diff conv
        compiler_params=pltpu.CompilerParams(
            dimension_semantics=("parallel", "arbitrary")),
    )(x_pad, emb_d, emb_m, mask_d, mask_m,
      d_w1f, d_w2, d_b2, m_w1f, m_w2p, m_b2p)

    return out.reshape(B, 3, H, W)                                   # NCHW


# ----------------------------------------------------------------------------
# Demo
# ----------------------------------------------------------------------------
if __name__ == "__main__":
    image_size = 16
    hidden_channels = 8
    batch = 2
    n_objects = 3
    y_dim = 10
    temb_dim = 16
    diff_mid = 32

    key = jax.random.PRNGKey(0)
    kp, kx, ky, km, kt = jax.random.split(key, 5)

    params = init_params(kp, y_dim=y_dim, hidden_channels=hidden_channels,
                         image_size=image_size, temb_dim=temb_dim,
                         diff_mid=diff_mid)

    x = jax.random.normal(kx, (batch, 3, image_size, image_size), jnp.float32)
    t = jax.random.randint(kt, (batch,), 0, 1000).astype(jnp.float32)
    y = jax.random.normal(ky, (batch, n_objects, y_dim), jnp.float32)
    mask = (jax.random.uniform(km, (batch, n_objects)) > 0.3).astype(jnp.float32)

    fwd = functools.partial(rnn_devil_forward, image_size=image_size,
                            hidden_channels=hidden_channels, temb_dim=temb_dim)
    out = jax.jit(fwd)(params, x, t, y, mask)
    out = jax.block_until_ready(out)

    assert out.shape == (batch, 3, image_size, image_size), out.shape
    assert jnp.all(jnp.isfinite(out))
    print("KERNEL_OK")
</pallas_src>

<mosaic_0001>
module attributes {stable_mosaic.version = 11 : i64} {
  func.func @_fused_rnn_kernel(%arg0: i32, %arg1: i32, %arg2: memref<1x8x256xf32, #tpu.memory_space<vmem>>, %arg3: memref<1x1x32x1xf32, #tpu.memory_space<vmem>>, %arg4: memref<1x1x32x1xf32, #tpu.memory_space<vmem>>, %arg5: memref<72x256xf32, #tpu.memory_space<vmem>>, %arg6: memref<144x256xf32, #tpu.memory_space<vmem>>, %arg7: memref<32x72xbf16, #tpu.memory_space<vmem>>, %arg8: memref<3x32xbf16, #tpu.memory_space<vmem>>, %arg9: memref<3x1xf32, #tpu.memory_space<vmem>>, %arg10: memref<32x144xbf16, #tpu.memory_space<vmem>>, %arg11: memref<13x32xbf16, #tpu.memory_space<vmem>>, %arg12: memref<13x1xf32, #tpu.memory_space<vmem>>, %arg13: memref<1x3x256xf32, #tpu.memory_space<vmem>>, %arg14: memref<13x256xf32, #tpu.memory_space<vmem>>, %arg15: memref<32x256xf32, #tpu.memory_space<vmem>>) attributes {dimension_semantics = [#tpu.dimension_semantics<parallel>, #tpu.dimension_semantics<arbitrary>], iteration_bounds = array<i64: 2, 3>, scalar_prefetch = 0 : i64, scratch_operands = 2 : i64, tpu.core_type = #tpu.core_type<tc>, window_params = [{transform_indices = @transform_0, window_bounds = array<i64: 1, 8, 256>}, {transform_indices = @transform_1, window_bounds = array<i64: 1, 1, 32, 1>}, {transform_indices = @transform_2, window_bounds = array<i64: 1, 1, 32, 1>}, {pipeline_mode = #tpu.pipeline_mode<synchronous>, transform_indices = @transform_3, window_bounds = array<i64: 72, 256>}, {pipeline_mode = #tpu.pipeline_mode<synchronous>, transform_indices = @transform_4, window_bounds = array<i64: 144, 256>}, {pipeline_mode = #tpu.pipeline_mode<synchronous>, transform_indices = @transform_5, window_bounds = array<i64: 32, 72>}, {pipeline_mode = #tpu.pipeline_mode<synchronous>, transform_indices = @transform_6, window_bounds = array<i64: 3, 32>}, {pipeline_mode = #tpu.pipeline_mode<synchronous>, transform_indices = @transform_7, window_bounds = array<i64: 3, 1>}, {pipeline_mode = #tpu.pipeline_mode<synchronous>, transform_indices = @transform_8, window_bounds = array<i64: 32, 144>}, {pipeline_mode = #tpu.pipeline_mode<synchronous>, transform_indices = @transform_9, window_bounds = array<i64: 13, 32>}, {pipeline_mode = #tpu.pipeline_mode<synchronous>, transform_indices = @transform_10, window_bounds = array<i64: 13, 1>}, {transform_indices = @transform_11, window_bounds = array<i64: 1, 3, 256>}]} {
    %c0_i32 = arith.constant 0 : i32
    %0 = arith.cmpi eq, %arg1, %c0_i32 : i32
    %1 = arith.extui %0 : i1 to i32
    %c0_i32_0 = arith.constant 0 : i32
    %2 = arith.cmpi ne, %1, %c0_i32_0 : i32
    scf.if %2 {
      %cst_31 = arith.constant 0.000000e+00 : f32
      %56 = vector.broadcast %cst_31 : f32 to vector<13x256xf32>
      %c0_32 = arith.constant 0 : index
      %c0_33 = arith.constant 0 : index
      %57 = vector.load %arg14[%c0_32, %c0_33] : memref<13x256xf32, #tpu.memory_space<vmem>>, vector<13x256xf32>
      tpu.vector_store %arg14[%c0_32, %c0_33], %56 {strides = array<i32>} : memref<13x256xf32, #tpu.memory_space<vmem>>, vector<13x256xf32>,
      %c0_34 = arith.constant 0 : index
      %c0_35 = arith.constant 0 : index
      %c0_36 = arith.constant 0 : index
      %58 = vector.load %arg2[%c0_34, %c0_35, %c0_36] : memref<1x8x256xf32, #tpu.memory_space<vmem>>, vector<1x8x256xf32>
      %59 = vector.shape_cast %58 : vector<1x8x256xf32> to vector<8x256xf32>
      %c17_i32_37 = arith.constant 17 : i32
      %60 = tpu.dynamic_rotate %59 by %c17_i32_37 dim 1 : vector<8x256xf32>, i32 -> vector<8x256xf32>
      %c16_i32_38 = arith.constant 16 : i32
      %61 = tpu.dynamic_rotate %59 by %c16_i32_38 dim 1 : vector<8x256xf32>, i32 -> vector<8x256xf32>
      %c15_i32_39 = arith.constant 15 : i32
      %62 = tpu.dynamic_rotate %59 by %c15_i32_39 dim 1 : vector<8x256xf32>, i32 -> vector<8x256xf32>
      %c1_i32_40 = arith.constant 1 : i32
      %63 = tpu.dynamic_rotate %59 by %c1_i32_40 dim 1 : vector<8x256xf32>, i32 -> vector<8x256xf32>
      %c255_i32_41 = arith.constant 255 : i32
      %64 = tpu.dynamic_rotate %59 by %c255_i32_41 dim 1 : vector<8x256xf32>, i32 -> vector<8x256xf32>
      %c241_i32_42 = arith.constant 241 : i32
      %65 = tpu.dynamic_rotate %59 by %c241_i32_42 dim 1 : vector<8x256xf32>, i32 -> vector<8x256xf32>
      %c240_i32_43 = arith.constant 240 : i32
      %66 = tpu.dynamic_rotate %59 by %c240_i32_43 dim 1 : vector<8x256xf32>, i32 -> vector<8x256xf32>
      %c239_i32_44 = arith.constant 239 : i32
      %67 = tpu.dynamic_rotate %59 by %c239_i32_44 dim 1 : vector<8x256xf32>, i32 -> vector<8x256xf32>
      %68 = tpu.concatenate %60, %61, %62, %63, %59, %64, %65, %66, %67 in 0 : vector<8x256xf32>, vector<8x256xf32>, vector<8x256xf32>, vector<8x256xf32>, vector<8x256xf32>, vector<8x256xf32>, vector<8x256xf32>, vector<8x256xf32>, vector<8x256xf32> -> vector<72x256xf32>
      %c0_45 = arith.constant 0 : index
      %c0_46 = arith.constant 0 : index
      %69 = vector.load %arg5[%c0_45, %c0_46] : memref<72x256xf32, #tpu.memory_space<vmem>>, vector<72x256xf32>
      %70 = arith.mulf %68, %69 : vector<72x256xf32>
      %71 = arith.truncf %70 : vector<72x256xf32> to vector<72x256xbf16>
      %c0_47 = arith.constant 0 : index
      %c0_48 = arith.constant 0 : index
      %72 = vector.load %arg7[%c0_47, %c0_48] : memref<32x72xbf16, #tpu.memory_space<vmem>>, vector<32x72xbf16>
      %cst_49 = arith.constant dense<0.000000e+00> : vector<32x256xf32>
      %73 = tpu.matmul %72, %71, %cst_49 {dimension_numbers = #tpu.dot_dimension_numbers<[1], [0], [0], [1], [0, 0, 1, 1], [], []>} : vector<32x72xbf16>, vector<72x256xbf16>, vector<32x256xf32> -> vector<32x256xf32>
      %c0_50 = arith.constant 0 : index
      %c0_51 = arith.constant 0 : index
      %74 = vector.load %arg15[%c0_50, %c0_51] : memref<32x256xf32, #tpu.memory_space<vmem>>, vector<32x256xf32>
      tpu.vector_store %arg15[%c0_50, %c0_51], %73 {strides = array<i32>} : memref<32x256xf32, #tpu.memory_space<vmem>>, vector<32x256xf32>,
    } else {
    }
    %c0 = arith.constant 0 : index
    %c0_1 = arith.constant 0 : index
    %3 = vector.load %arg15[%c0, %c0_1] : memref<32x256xf32, #tpu.memory_space<vmem>>, vector<32x256xf32>
    %c0_2 = arith.constant 0 : index
    %c0_3 = arith.constant 0 : index
    %c0_4 = arith.constant 0 : index
    %c0_5 = arith.constant 0 : index
    %4 = vector.load %arg3[%c0_2, %c0_3, %c0_4, %c0_5] : memref<1x1x32x1xf32, #tpu.memory_space<vmem>>, vector<1x1x32x1xf32>
    %5 = vector.shape_cast %4 : vector<1x1x32x1xf32> to vector<32x1xf32>
    %6 = vector.broadcast %5 : vector<32x1xf32> to vector<32x256xf32>
    %7 = arith.addf %3, %6 : vector<32x256xf32>
    %8 = arith.negf %7 : vector<32x256xf32>
    %9 = math.exp %8 : vector<32x256xf32>
    %cst = arith.constant 1.000000e+00 : f32
    %10 = vector.broadcast %cst : f32 to vector<32x256xf32>
    %11 = arith.addf %10, %9 : vector<32x256xf32>
    %12 = arith.divf %10, %11 : vector<32x256xf32>
    %13 = arith.mulf %7, %12 : vector<32x256xf32>
    %c0_6 = arith.constant 0 : index
    %c0_7 = arith.constant 0 : index
    %14 = vector.load %arg8[%c0_6, %c0_7] : memref<3x32xbf16, #tpu.memory_space<vmem>>, vector<3x32xbf16>
    %15 = arith.truncf %13 : vector<32x256xf32> to vector<32x256xbf16>
    %cst_8 = arith.constant dense<0.000000e+00> : vector<3x256xf32>
    %16 = tpu.matmul %14, %15, %cst_8 {dimension_numbers = #tpu.dot_dimension_numbers<[1], [0], [0], [1], [0, 0, 1, 1], [], []>} : vector<3x32xbf16>, vector<32x256xbf16>, vector<3x256xf32> -> vector<3x256xf32>
    %c0_9 = arith.constant 0 : index
    %c0_10 = arith.constant 0 : index
    %17 = vector.load %arg9[%c0_9, %c0_10] : memref<3x1xf32, #tpu.memory_space<vmem>>, vector<3x1xf32>
    %18 = vector.broadcast %17 : vector<3x1xf32> to vector<3x256xf32>
    %19 = arith.addf %16, %18 : vector<3x256xf32>
    %c0_11 = arith.constant 0 : index
    %c0_12 = arith.constant 0 : index
    %20 = vector.load %arg14[%c0_11, %c0_12] : memref<13x256xf32, #tpu.memory_space<vmem>>, vector<13x256xf32>
    %21 = tpu.concatenate %19, %20 in 0 : vector<3x256xf32>, vector<13x256xf32> -> vector<16x256xf32>
    %c17_i32 = arith.constant 17 : i32
    %22 = tpu.dynamic_rotate %21 by %c17_i32 dim 1 : vector<16x256xf32>, i32 -> vector<16x256xf32>
    %c16_i32 = arith.constant 16 : i32
    %23 = tpu.dynamic_rotate %21 by %c16_i32 dim 1 : vector<16x256xf32>, i32 -> vector<16x256xf32>
    %c15_i32 = arith.constant 15 : i32
    %24 = tpu.dynamic_rotate %21 by %c15_i32 dim 1 : vector<16x256xf32>, i32 -> vector<16x256xf32>
    %c1_i32 = arith.constant 1 : i32
    %25 = tpu.dynamic_rotate %21 by %c1_i32 dim 1 : vector<16x256xf32>, i32 -> vector<16x256xf32>
    %c255_i32 = arith.constant 255 : i32
    %26 = tpu.dynamic_rotate %21 by %c255_i32 dim 1 : vector<16x256xf32>, i32 -> vector<16x256xf32>
    %c241_i32 = arith.constant 241 : i32
    %27 = tpu.dynamic_rotate %21 by %c241_i32 dim 1 : vector<16x256xf32>, i32 -> vector<16x256xf32>
    %c240_i32 = arith.constant 240 : i32
    %28 = tpu.dynamic_rotate %21 by %c240_i32 dim 1 : vector<16x256xf32>, i32 -> vector<16x256xf32>
    %c239_i32 = arith.constant 239 : i32
    %29 = tpu.dynamic_rotate %21 by %c239_i32 dim 1 : vector<16x256xf32>, i32 -> vector<16x256xf32>
    %30 = tpu.concatenate %22, %23, %24, %25, %21, %26, %27, %28, %29 in 0 : vector<16x256xf32>, vector<16x256xf32>, vector<16x256xf32>, vector<16x256xf32>, vector<16x256xf32>, vector<16x256xf32>, vector<16x256xf32>, vector<16x256xf32>, vector<16x256xf32> -> vector<144x256xf32>
    %c0_13 = arith.constant 0 : index
    %c0_14 = arith.constant 0 : index
    %31 = vector.load %arg6[%c0_13, %c0_14] : memref<144x256xf32, #tpu.memory_space<vmem>>, vector<144x256xf32>
    %32 = arith.mulf %30, %31 : vector<144x256xf32>
    %33 = arith.truncf %32 : vector<144x256xf32> to vector<144x256xbf16>
    %c0_15 = arith.constant 0 : index
    %c0_16 = arith.constant 0 : index
    %34 = vector.load %arg10[%c0_15, %c0_16] : memref<32x144xbf16, #tpu.memory_space<vmem>>, vector<32x144xbf16>
    %cst_17 = arith.constant dense<0.000000e+00> : vector<32x256xf32>
    %35 = tpu.matmul %34, %33, %cst_17 {dimension_numbers = #tpu.dot_dimension_numbers<[1], [0], [0], [1], [0, 0, 1, 1], [], []>} : vector<32x144xbf16>, vector<144x256xbf16>, vector<32x256xf32> -> vector<32x256xf32>
    %c0_18 = arith.constant 0 : index
    %c0_19 = arith.constant 0 : index
    %c0_20 = arith.constant 0 : index
    %c0_21 = arith.constant 0 : index
    %36 = vector.load %arg4[%c0_18, %c0_19, %c0_20, %c0_21] : memref<1x1x32x1xf32, #tpu.memory_space<vmem>>, vector<1x1x32x1xf32>
    %37 = vector.shape_cast %36 : vector<1x1x32x1xf32> to vector<32x1xf32>
    %38 = vector.broadcast %37 : vector<32x1xf32> to vector<32x256xf32>
    %39 = arith.addf %35, %38 : vector<32x256xf32>
    %40 = arith.negf %39 : vector<32x256xf32>
    %41 = math.exp %40 : vector<32x256xf32>
    %cst_22 = arith.constant 1.000000e+00 : f32
    %42 = vector.broadcast %cst_22 : f32 to vector<32x256xf32>
    %43 = arith.addf %42, %41 : vector<32x256xf32>
    %44 = arith.divf %42, %43 : vector<32x256xf32>
    %45 = arith.mulf %39, %44 : vector<32x256xf32>
    %c0_23 = arith.constant 0 : index
    %c0_24 = arith.constant 0 : index
    %46 = vector.load %arg11[%c0_23, %c0_24] : memref<13x32xbf16, #tpu.memory_space<vmem>>, vector<13x32xbf16>
    %47 = arith.truncf %45 : vector<32x256xf32> to vector<32x256xbf16>
    %cst_25 = arith.constant dense<0.000000e+00> : vector<13x256xf32>
    %48 = tpu.matmul %46, %47, %cst_25 {dimension_numbers = #tpu.dot_dimension_numbers<[1], [0], [0], [1], [0, 0, 1, 1], [], []>} : vector<13x32xbf16>, vector<32x256xbf16>, vector<13x256xf32> -> vector<13x256xf32>
    %c0_26 = arith.constant 0 : index
    %c0_27 = arith.constant 0 : index
    %49 = vector.load %arg12[%c0_26, %c0_27] : memref<13x1xf32, #tpu.memory_space<vmem>>, vector<13x1xf32>
    %50 = vector.broadcast %49 : vector<13x1xf32> to vector<13x256xf32>
    %51 = arith.addf %48, %50 : vector<13x256xf32>
    %c0_28 = arith.constant 0 : index
    %c0_29 = arith.constant 0 : index
    %52 = vector.load %arg14[%c0_28, %c0_29] : memref<13x256xf32, #tpu.memory_space<vmem>>, vector<13x256xf32>
    tpu.vector_store %arg14[%c0_28, %c0_29], %51 {strides = array<i32>} : memref<13x256xf32, #tpu.memory_space<vmem>>, vector<13x256xf32>,
    %c2_i32 = arith.constant 2 : i32
    %53 = arith.cmpi eq, %arg1, %c2_i32 : i32
    %54 = arith.extui %53 : i1 to i32
    %c0_i32_30 = arith.constant 0 : i32
    %55 = arith.cmpi ne, %54, %c0_i32_30 : i32
    scf.if %55 {
      %56 = vector.extract_strided_slice %51 {offsets = [0, 0], sizes = [3, 256], strides = [1, 1]} : vector<13x256xf32> to vector<3x256xf32>
      %c0_31 = arith.constant 0 : index
      %c0_32 = arith.constant 0 : index
      %c0_33 = arith.constant 0 : index
      %57 = vector.load %arg13[%c0_31, %c0_32, %c0_33] : memref<1x3x256xf32, #tpu.memory_space<vmem>>, vector<1x3x256xf32>
      %58 = vector.shape_cast %57 : vector<1x3x256xf32> to vector<3x256xf32>
      %59 = vector.shape_cast %56 : vector<3x256xf32> to vector<1x3x256xf32>
      tpu.vector_store %arg13[%c0_31, %c0_32, %c0_33], %59 {strides = array<i32>} : memref<1x3x256xf32, #tpu.memory_space<vmem>>, vector<1x3x256xf32>,
    } else {
    }
    return
  }
  func.func @transform_0(%arg0: i32, %arg1: i32) -> (i32, i32, i32) {
    %c0_i32 = arith.constant 0 : i32
    %c0_i32_0 = arith.constant 0 : i32
    %c0_i32_1 = arith.constant 0 : i32
    return %arg0, %c0_i32, %c0_i32_0 : i32, i32, i32
  }
  func.func @transform_1(%arg0: i32, %arg1: i32) -> (i32, i32, i32, i32) {
    %c0_i32 = arith.constant 0 : i32
    %c0_i32_0 = arith.constant 0 : i32
    %c0_i32_1 = arith.constant 0 : i32
    return %arg0, %arg1, %c0_i32, %c0_i32_0 : i32, i32, i32, i32
  }
  func.func @transform_2(%arg0: i32, %arg1: i32) -> (i32, i32, i32, i32) {
    %c0_i32 = arith.constant 0 : i32
    %c0_i32_0 = arith.constant 0 : i32
    %c0_i32_1 = arith.constant 0 : i32
    return %arg0, %arg1, %c0_i32, %c0_i32_0 : i32, i32, i32, i32
  }
  func.func @transform_3(%arg0: i32, %arg1: i32) -> (i32, i32) {
    %c0_i32 = arith.constant 0 : i32
    %c0_i32_0 = arith.constant 0 : i32
    %c0_i32_1 = arith.constant 0 : i32
    return %c0_i32, %c0_i32_0 : i32, i32
  }
  func.func @transform_4(%arg0: i32, %arg1: i32) -> (i32, i32) {
    %c0_i32 = arith.constant 0 : i32
    %c0_i32_0 = arith.constant 0 : i32
    %c0_i32_1 = arith.constant 0 : i32
    return %c0_i32, %c0_i32_0 : i32, i32
  }
  func.func @transform_5(%arg0: i32, %arg1: i32) -> (i32, i32) {
    %c0_i32 = arith.constant 0 : i32
    %c0_i32_0 = arith.constant 0 : i32
    %c0_i32_1 = arith.constant 0 : i32
    return %c0_i32, %c0_i32_0 : i32, i32
  }
  func.func @transform_6(%arg0: i32, %arg1: i32) -> (i32, i32) {
    %c0_i32 = arith.constant 0 : i32
    %c0_i32_0 = arith.constant 0 : i32
    %c0_i32_1 = arith.constant 0 : i32
    return %c0_i32, %c0_i32_0 : i32, i32
  }
  func.func @transform_7(%arg0: i32, %arg1: i32) -> (i32, i32) {
    %c0_i32 = arith.constant 0 : i32
    %c0_i32_0 = arith.constant 0 : i32
    %c0_i32_1 = arith.constant 0 : i32
    return %c0_i32, %c0_i32_0 : i32, i32
  }
  func.func @transform_8(%arg0: i32, %arg1: i32) -> (i32, i32) {
    %c0_i32 = arith.constant 0 : i32
    %c0_i32_0 = arith.constant 0 : i32
    %c0_i32_1 = arith.constant 0 : i32
    return %c0_i32, %c0_i32_0 : i32, i32
  }
  func.func @transform_9(%arg0: i32, %arg1: i32) -> (i32, i32) {
    %c0_i32 = arith.constant 0 : i32
    %c0_i32_0 = arith.constant 0 : i32
    %c0_i32_1 = arith.constant 0 : i32
    return %c0_i32, %c0_i32_0 : i32, i32
  }
  func.func @transform_10(%arg0: i32, %arg1: i32) -> (i32, i32) {
    %c0_i32 = arith.constant 0 : i32
    %c0_i32_0 = arith.constant 0 : i32
    %c0_i32_1 = arith.constant 0 : i32
    return %c0_i32, %c0_i32_0 : i32, i32
  }
  func.func @transform_11(%arg0: i32, %arg1: i32) -> (i32, i32, i32) {
    %c0_i32 = arith.constant 0 : i32
    %c0_i32_0 = arith.constant 0 : i32
    %c0_i32_1 = arith.constant 0 : i32
    return %arg0, %c0_i32, %c0_i32_0 : i32, i32, i32
  }
}

</mosaic_0001>

<bundles_post_ra>
// kernel: rnn_devil_forward.1
= control target key start
LH: loop header
LB: loop body
LE: loop exit
PB: predicated region body
PF: predicated region fallthrough
CT: control target
= control target key end

     0   :  { %s1705_s17 = smov 0   ;;  %s1707_s18 = smov 0   ;;  %s2253_s0 = inlined_call_operand.vmem [shape: f32[2,8,256], index: 0, kind: input, shape index: {}]   ;;  %s2254_s1 = inlined_call_operand.vmem [shape: f32[2,3,32,1], index: 1, kind: input, shape index: {}]   ;;  %s2255_s2 = inlined_call_operand.vmem [shape: f32[2,3,32,1], index: 2, kind: input, shape index: {}]   ;;  %s2256_s3 = inlined_call_operand.vmem [shape: f32[72,256], index: 3, kind: input, shape index: {}]   ;;  %s2257_s4 = inlined_call_operand.vmem [shape: f32[144,256], index: 4, kind: input, shape index: {}]   ;;  %s2258_s5 = inlined_call_operand.vmem [shape: bf16[32,72], index: 5, kind: input, shape index: {}]   ;;  %s2259_s6 = inlined_call_operand.vmem [shape: bf16[3,32], index: 6, kind: input, shape index: {}]   ;;  %s2260_s7 = inlined_call_operand.vmem [shape: f32[3,1], index: 7, kind: input, shape index: {}]   ;;  %s2261_s8 = inlined_call_operand.vmem [shape: bf16[32,144], index: 8, kind: input, shape index: {}]   ;;  %s2262_s9 = inlined_call_operand.vmem [shape: bf16[13,32], index: 9, kind: input, shape index: {}]   ;;  %s2263_s10 = inlined_call_operand.vmem [shape: f32[13,1], index: 10, kind: input, shape index: {}]   ;;  %s2264_s11 = inlined_call_operand.vmem [shape: f32[2,3,256], index: 11, kind: output, shape index: {}]  }
   0x1   :  { %2269 = sst [smem:[#allocation9_spill]] %s2257_s4  ;;  %s1709_s19 = smov 0  }
   0x2   :  { %2270 = sst [smem:[#allocation10_spill]] %s2262_s9  ;;  %s1711_s20 = smov 0  }
   0x3   :  { %s1713_s21 = smov 0  }
   0x4 LB: > { %2271 = sst [smem:[#allocation4_spill]] %s1616_s19  ;;  %s30_s22 = sadd.s32 1, %s1616_s19  ;;  %s1624_s21 = sphi %s1713_s21, %s21_s21   ;;  %s1620_s20 = sphi %s1711_s20, %s2282_s20   ;;  %s1616_s19 = sphi %s1709_s19, %s2281_s19   ;;  %s1612_s18 = sphi %s1707_s18, %s2280_s18   ;;  %s1608_s17 = sphi %s1705_s17, %s2279_s17  }
   0x5   : > { %2272 = sst [smem:[#allocation5_spill]] %s1620_s20  ;;  %s33_s23 = sadd.s32 1, %s1620_s20 }
   0x6   : > { %2273 = sst [smem:[#allocation6_spill]] %s1624_s21  ;;  %p31_p0 = scmp.ge.s32.totalorder %s30_s22, 3 }
   0x7   : > { %p1396_p1 = scmp.ge.s32.totalorder %s1624_s21, 1  ;;  %p381_p2 = scmp.lt.s32.totalorder %s1624_s21, 7 }
   0x8   : > { %s2284_s22 = smov (%p31_p0, %s30_s22), 0  ;;  %s2286_s23 = smov (!%p31_p0, %s33_s23), %s1620_s20 }
   0x9   : > { %2274 = sst [smem:[#allocation7_spill]] %s2284_s22  ;;  %p382_p3 = pnand %p1396_p1, %p381_p2 }
   0xa   : > { %p35_p4 = scmp.ge.s32.totalorder %s2286_s23, 2  ;;  %p439_p5 = scmp.lt.s32.totalorder (!%p382_p3), %s1612_s18, 1 }
   0xb   : > { %385 = sbr.rel (%p382_p3) target bundleno = 1396 (0x574), region = 64  ;;  %p446_p6 = scmp.lt.s32.totalorder (!%p382_p3), %s1608_s17, 2 }
   0xc   : > { %s2288_s23 = smov (%p35_p4, %s2286_s23), 0  ;;  %p1405_p7 = scmp.ne.s32.totalorder (!%p382_p3), %s1608_s17, 0 }
   0xd   : > { %2275 = sst [smem:[#allocation8_spill]] %s2288_s23 }
  0x10   : > { %s2290_s18 = smov (!%p439_p5, %s1612_s18), 1  ;;  %s1629_s9 = smov (!%p1405_p7), 112  }
  0x11   : > { %s447_s24 = scalar_select %p446_p6, %s1608_s17, 2 }
  0x12   : > { %s1439_s25 = sshll.u32 %s2290_s18, 4  ;;  %s1451_s26 = smul.u32 12, %s2290_s18 }
  0x13   : > { %s443_s29 = scalar_lea.vmem %s2253_s0, %s1439_s25  ;;  %s1399_s30 = sshll.u32 %s447_s24, 2 }
  0x14   : > { %s450_s12 = sadd.s32 %s1451_s26, %s1399_s30  ;;  %s1440_s13 = sshll.u32 %s2290_s18, 3 }
  0x15   : > { %s1400_s14 = sshll.u32 %s450_s12, 3  ;;  %s1745_s23 = scalar_lea.vmem %s2264_s11, %s1440_s13 }
  0x16   : > { %s1750_s19 = scalar_lea.vmem %s2254_s1, %s1400_s14  ;;  %s1755_s4 = scalar_lea.vmem %s2255_s2, %s1400_s14 }
  0x17   : > { %471 = sbr.rel (%p1405_p7) target bundleno = 381 (0x17d), region = 68  ;;  %s1626_s18 = smov (!%p1405_p7), 113  }
  0x18   : > { %s1627_s24 = smov (!%p1405_p7), 111   ;;  %s1630_s20 = smov (!%p1405_p7), 127  }
  0x19   : > { %s1631_s21 = smov (!%p1405_p7), 15   ;;  %s1632_s22 = smov (!%p1405_p7), 1  }
  0x1a   : > { %s1634_s25 = smov (!%p1405_p7), 17   ;;  %s1635_s26 = smov (!%p1405_p7), 16  }
  0x1c   : > { %v1758_v0 = vld [vmem:[%s443_s29] sm:$0xff]  ;;  %v1628_v1 = vmov 0.0   ;;  %v1762_v2 = vld [vmem:[%s443_s29 + $0x8] sm:$0xff]  ;;  %v1633_v3 = vmov 0   ;;  %v482_v4 = vlaneseq  ;;  %v550_v20 = vld [vmem:[%s2256_s3 + $0x70] sm:$0xff]  ;;  %vm603_vm3 = vcmask 1043456  }
  0x1d   : > { %515 = vrot.lane.b32.xlu1 %v1758_v0, %s1626_s18  ;;  %529 = vrot.lane.b32.xlu0 %v1758_v0, %s1627_s24  ;;  %472 = vst [vmem:[#allocation2 + $0x10] sm:$0xff] %v1628_v1  ;;  %473 = vst [vmem:[#allocation2] sm:$0xff] %v1628_v1  ;;  %v552_v8 = vld [vmem:[%s2256_s3 + $0x80] sm:$0xff]  ;;  %v553_v9 = vld [vmem:[%s2256_s3 + $0x88] sm:$0xff]  ;;  %vm596_vm9 = vcmask 588800  }
  0x1e   : > { %474 = vst [vmem:[#allocation2 + $0x18] sm:$0x1f] %v1628_v1  ;;  %475 = vst [vmem:[#allocation2 + $0x8] sm:$0x1f] %v1628_v1  ;;  %642 = vmatprep.mubr.bf16.mxu0 %v1633_v3  ;;  %652 = vmatprep.mubr.bf16.mxu1 %v1633_v3  ;;  %v1778_v5 = vand.u32 127, %v482_v4  ;;  %v548_v14 = vld [vmem:[%s2256_s3 + $0x60] sm:$0xff] }
  0x1f   : > { %v549_v18 = vld [vmem:[%s2256_s3 + $0x68] sm:$0xff]  ;;  %v551_v21 = vld [vmem:[%s2256_s3 + $0x78] sm:$0xff]  ;;  %v544_v30 = vld [vmem:[%s2256_s3 + $0x40] sm:$0xff] }
  0x20   : > { %vm533_vm0 = vcmp.lt.s32.totalorder %v1778_v5, 111  ;;  %vm519_vm1 = vcmp.lt.s32.totalorder %v1778_v5, 113  ;;  %vm526_vm2 = vcmp.lt.s32.totalorder %v1778_v5, 112  ;;  %vm512_vm4 = vcmp.lt.s32.totalorder %v1778_v5, 127  ;;  %v545_v29 = vld [vmem:[%s2256_s3 + $0x48] sm:$0xff]  ;;  %v546_v35 = vld [vmem:[%s2256_s3 + $0x50] sm:$0xff] }
  0x21   : > { %517 = vrot.lane.b32.xlu1 %v1762_v2, %s1626_s18  ;;  %531 = vrot.lane.b32.xlu0 %v1762_v2, %s1627_s24  ;;  %v547_v36 = vld [vmem:[%s2256_s3 + $0x58] sm:$0xff]  ;;  %v563_v41 = vmul.f32 %v545_v29, %v1762_v2  ;;  %v562_v42 = vmul.f32 %v544_v30, %v1758_v0  ;;  %vm498_vm5 = vcmp.lt.s32.totalorder %v1778_v5, 15  ;;  %v540_v51 = vld [vmem:[%s2256_s3 + $0x20] sm:$0xff]  ;;  %vm505_vm6 = vcmp.lt.s32.totalorder %v1778_v5, 1 }
  0x22   : > { %v541_v52 = vld [vmem:[%s2256_s3 + $0x28] sm:$0xff]  ;;  %v542_v55 = vld [vmem:[%s2256_s3 + $0x30] sm:$0xff]  ;;  %v543_v56 = vld [vmem:[%s2256_s3 + $0x38] sm:$0xff]  ;;  %vm484_vm7 = vcmp.lt.s32.totalorder %v1778_v5, 17  ;;  %vm491_vm8 = vcmp.lt.s32.totalorder %v1778_v5, 16 }
  0x25   : > { %524 = vrot.lane.b32.xlu1 %v1762_v2, %s1629_s9  ;;  %522 = vrot.lane.b32.xlu0 %v1758_v0, %s1629_s9 }
  0x29   : > { %510 = vrot.lane.b32.xlu1 %v1762_v2, %s1630_s20  ;;  %508 = vrot.lane.b32.xlu0 %v1758_v0, %s1630_s20 }
  0x2d   : > { %496 = vrot.lane.b32.xlu1 %v1762_v2, %s1631_s21  ;;  %494 = vrot.lane.b32.xlu0 %v1758_v0, %s1631_s21 }
  0x31   : > { %503 = vrot.lane.b32.xlu1 %v1762_v2, %s1632_s22  ;;  %501 = vrot.lane.b32.xlu0 %v1758_v0, %s1632_s22 }
  0x35   : > { %480 = vrot.lane.b32.xlu1 %v1762_v2, %s1634_s25  ;;  %478 = vrot.lane.b32.xlu0 %v1758_v0, %s1634_s25 }
  0x39   : > { %489 = vrot.lane.b32.xlu1 %v1762_v2, %s1635_s26  ;;  %487 = vrot.lane.b32.xlu0 %v1758_v0, %s1635_s26 }
  0x8f   : > { %v516_v6 = vpop.permute.xlu1 %515  ;;  %v530_v7 = vpop.permute.xlu0 %529 }
  0x93   : > { %v518_v10 = vpop.permute.xlu1 %517  ;;  %v532_v11 = vpop.permute.xlu0 %531 }
  0x94   : > { %v534_v12 = vsel %vm533_vm0, %v530_v7, %v532_v11  ;;  %v535_v13 = vsel %vm533_vm0, %v532_v11, %v530_v7  ;;  %v520_v15 = vsel %vm519_vm1, %v516_v6, %v518_v10  ;;  %v521_v19 = vsel %vm519_vm1, %v518_v10, %v516_v6  ;;  %v536_v6 = vld [vmem:[%s2256_s3] sm:$0xff]  ;;  %v537_v7 = vld [vmem:[%s2256_s3 + $0x8] sm:$0xff]  ;;  %v538_v10 = vld [vmem:[%s2256_s3 + $0x10] sm:$0xff] }
  0x95   : > { %v570_v16 = vmul.f32 %v552_v8, %v534_v12  ;;  %v571_v17 = vmul.f32 %v553_v9, %v535_v13  ;;  %v566_v26 = vmul.f32 %v548_v14, %v520_v15  ;;  %v567_v31 = vmul.f32 %v549_v18, %v521_v19  ;;  %v539_v11 = vld [vmem:[%s2256_s3 + $0x18] sm:$0xff] }
  0x97   : > { %v525_v22 = vpop.permute.xlu1 %524  ;;  %v523_v23 = vpop.permute.xlu0 %522  ;;  %v581_v24 = vpack.c.bf16 %v571_v17, %v571_v17  ;;  %v580_v25 = vpack.c.bf16 %v570_v16, %v570_v16 }
  0x98   : > { %v527_v27 = vsel %vm526_vm2, %v523_v23, %v525_v22  ;;  %v528_v28 = vsel %vm526_vm2, %v525_v22, %v523_v23  ;;  %v1512_v22 = vld [vmem:[%s2258_s5 + $0x8] sm:$0xff]  }
  0x99   : > { %v568_v32 = vmul.f32 %v550_v20, %v527_v27  ;;  %v569_v33 = vmul.f32 %v551_v21, %v528_v28  ;;  %1408 = vmatprep.subr.msk.bf16.mxu0 %vm603_vm3, %v581_v24  ;;  %1441 = vmatprep.subr.msk.bf16.mxu1 %vm603_vm3, %v581_v24  ;;  %v605_v34 = vsel %vm603_vm3, %v580_v25, 0  ;;  %v1511_v21 = vld [vmem:[%s2258_s5] sm:$0xff]  }
  0x9a   : > { %617 = vmatpush1.bf16.msra.mxu0 %v605_v34  ;;  %1446 = vmatpush1.bf16.msra.mxu1 %v605_v34 }
  0x9b   : > { %v511_v37 = vpop.permute.xlu1 %510  ;;  %v509_v38 = vpop.permute.xlu0 %508  ;;  %v579_v39 = vpack.c.bf16 %v569_v33, %v567_v31  ;;  %v578_v40 = vpack.c.bf16 %v568_v32, %v566_v26 }
  0x9c   : > { %v513_v43 = vsel %vm512_vm4, %v509_v38, %v511_v37  ;;  %v514_v44 = vsel %vm512_vm4, %v511_v37, %v509_v38 }
  0x9d   : > { %v564_v45 = vmul.f32 %v546_v35, %v513_v43  ;;  %v565_v46 = vmul.f32 %v547_v36, %v514_v44  ;;  %618 = vmatprep.subr.bf16.mxu0 %v579_v39  ;;  %1442 = vmatprep.subr.bf16.mxu1 %v579_v39 }
  0x9e   : > { %619 = vmatpush1.bf16.msra.mxu0 %v578_v40  ;;  %1447 = vmatpush1.bf16.msra.mxu1 %v578_v40 }
  0x9f   : > { %v497_v47 = vpop.permute.xlu1 %496  ;;  %v495_v48 = vpop.permute.xlu0 %494  ;;  %v577_v49 = vpack.c.bf16 %v565_v46, %v563_v41  ;;  %v576_v50 = vpack.c.bf16 %v564_v45, %v562_v42 }
  0xa0   : > { %v499_v53 = vsel %vm498_vm5, %v495_v48, %v497_v47  ;;  %v500_v54 = vsel %vm498_vm5, %v497_v47, %v495_v48 }
  0xa1   : > { %620 = vmatprep.subr.bf16.mxu0 %v577_v49  ;;  %1443 = vmatprep.subr.bf16.mxu1 %v577_v49  ;;  %v558_v61 = vmul.f32 %v540_v51, %v500_v54  ;;  %v559_v62 = vmul.f32 %v541_v52, %v499_v53 }
  0xa2   : > { %621 = vmatpush1.bf16.msra.mxu0 %v576_v50  ;;  %1448 = vmatpush1.bf16.msra.mxu1 %v576_v50 }
  0xa3   : > { %v504_v57 = vpop.permute.xlu1 %503  ;;  %v502_v58 = vpop.permute.xlu0 %501 }
  0xa4   : > { %v506_v59 = vsel %vm505_vm6, %v502_v58, %v504_v57  ;;  %v507_v60 = vsel %vm505_vm6, %v504_v57, %v502_v58 }
  0xa5   : > { %v560_v63 = vmul.f32 %v542_v55, %v507_v60  ;;  %v561_v0 = vmul.f32 %v543_v56, %v506_v59 }
  0xa7   : > { %v481_v1 = vpop.permute.xlu1 %480  ;;  %v479_v2 = vpop.permute.xlu0 %478  ;;  %v575_v3 = vpack.c.bf16 %v561_v0, %v559_v62  ;;  %v574_v4 = vpack.c.bf16 %v560_v63, %v558_v61 }
  0xa8   : > { %v485_v8 = vsel %vm484_vm7, %v479_v2, %v481_v1  ;;  %v486_v9 = vsel %vm484_vm7, %v481_v1, %v479_v2 }
  0xa9   : > { %622 = vmatprep.subr.bf16.mxu0 %v575_v3  ;;  %1444 = vmatprep.subr.bf16.mxu1 %v575_v3  ;;  %v554_v15 = vmul.f32 %v536_v6, %v486_v9  ;;  %v555_v16 = vmul.f32 %v537_v7, %v485_v8 }
  0xaa   : > { %623 = vmatpush1.bf16.msra.mxu0 %v574_v4  ;;  %1449 = vmatpush1.bf16.msra.mxu1 %v574_v4 }
  0xab   : > { %v490_v12 = vpop.permute.xlu1 %489  ;;  %v488_v13 = vpop.permute.xlu0 %487 }
  0xac   : > { %v492_v14 = vsel %vm491_vm8, %v488_v13, %v490_v12  ;;  %v493_v5 = vsel %vm491_vm8, %v490_v12, %v488_v13 }
  0xad   : > { %v556_v17 = vmul.f32 %v538_v10, %v493_v5  ;;  %v557_v18 = vmul.f32 %v539_v11, %v492_v14 }
  0xaf   : > { %v573_v19 = vpack.c.bf16 %v557_v18, %v555_v16  ;;  %v572_v20 = vpack.c.bf16 %v556_v17, %v554_v15 }
  0xb1   : > { %624 = vmatprep.subr.bf16.mxu0 %v573_v19  ;;  %1445 = vmatprep.subr.bf16.mxu1 %v573_v19 }
  0xb2   : > { %625 = vmatpush1.bf16.msra.mxu0 %v572_v20  ;;  %1450 = vmatpush1.bf16.msra.mxu1 %v572_v20 }
  0xb5   : > { %1409 = vmatmul.mubr.msk.bf16.vlgmr.msra.gmra.mxu0 %vm596_vm9, %v1511_v21  ;;  %1410 = vmatmul.mubr.msk.bf16.vlgmr.msra.gmra.mxu1 %vm596_vm9, %v1512_v22 }
 0x175   : > { %v644_v23 = vpop.f32.mrf.mxu0  ;;  %v654_v24 = vpop.f32.mrf.mxu1 }
 0x176   : > { %663 = vst [vmem:[#allocation3] sm:$0xff] %v644_v23  ;;  %667 = vst [vmem:[#allocation3 + $0x20] sm:$0xff] %v654_v24 }
 0x177   : > { %v646_v25 = vpop.f32.mrf.mxu0  ;;  %v656_v26 = vpop.f32.mrf.mxu1 }
 0x178   : > { %664 = vst [vmem:[#allocation3 + $0x38] sm:$0xff] %v646_v25  ;;  %668 = vst [vmem:[#allocation3 + $0x10] sm:$0xff] %v656_v26 }
 0x179   : > { %v648_v27 = vpop.f32.mrf.mxu0  ;;  %v658_v28 = vpop.f32.mrf.mxu1 }
 0x17a   : > { %665 = vst [vmem:[#allocation3 + $0x8] sm:$0xff] %v648_v27  ;;  %669 = vst [vmem:[#allocation3 + $0x30] sm:$0xff] %v658_v28 }
 0x17b   : > { %v650_v29 = vpop.f32.mrf.mxu0  ;;  %v660_v30 = vpop.f32.mrf.mxu1 }
 0x17c   : > { %666 = vst [vmem:[#allocation3 + $0x18] sm:$0xff] %v650_v29  ;;  %670 = vst [vmem:[#allocation3 + $0x28] sm:$0xff] %v660_v30 }
 0x17d PF: > { %v681_v31 = vld [vmem:[%s1750_s19 + $0x10] sm:$0xff]  ;;  %v679_v32 = vld [vmem:[%s1750_s19] sm:$0xff]  ;;  %v1636_v33 = vmov 0   ;;  %v682_v34 = vld [vmem:[%s1750_s19 + $0x18] sm:$0xff]  ;;  %vm831_vm10 = vcmask 1042432   ;;  %s1638_s16 = smov 113  }
 0x17e   : > { %1514 = vset.pattern.permute.xlu1 %v1636_v33  ;;  %1513 = vset.pattern.permute.xlu0 %v1636_v33  ;;  %v680_v35 = vld [vmem:[%s1750_s19 + $0x8] sm:$0xff]  ;;  %v1864_v36 = vld [vmem:[#allocation2 + $0x10] sm:$0xff]  ;;  %v825_v37 = vld [vmem:[#allocation2 + $0x18] sm:$0x1f]  ;;  %s1637_s19 = smov 112   ;;  %s1639_s18 = smov 127  }
 0x17f   : > { %695 = vperm.xlu0 %1513, %v681_v31   ;;  %685 = vperm.xlu1 %1514, %v679_v32   ;;  %v772_v38 = vld [vmem:[%s2260_s7] sm:$0x7]  ;;  %v832_v40 = vrot.slane %v1864_v36, 5  ;;  %v834_v41 = vrot.slane %v825_v37, 5  ;;  %v826_v42 = vld [vmem:[#allocation2 + $0x8] sm:$0x1f] }
 0x180   : > { %814 = vmatprep.mubr.bf16.mxu0 %v1636_v33  ;;  %v1869_v39 = vld [vmem:[#allocation2] sm:$0xff]  ;;  %v836_v45 = vrot.slane %v826_v42, 5  ;;  %s1640_s24 = smov 1   ;;  %s1641_s9 = smov 15   ;;  %v1047_v47 = vld [vmem:[%s1755_s4 + $0x18] sm:$0xff]  ;;  %v1045_v48 = vld [vmem:[%s1755_s4 + $0x8] sm:$0xff] }
 0x181   : > { %v1875_v43 = vsel %vm831_vm10, %v832_v40, %v834_v41  ;;  %v833_v44 = vrot.slane %v1869_v39, 5  ;;  %s1642_s20 = smov 16   ;;  %s1643_s21 = smov 17   ;;  %v1209_v49 = vld [vmem:[%s2263_s10 + $0x8] sm:$0x1f]  ;;  %v675_v50 = vld [vmem:[#allocation3 + $0x20] sm:$0xff] }
 0x182   : > { %s1644_s22 = smov 111   ;;  %v676_v51 = vld [vmem:[#allocation3 + $0x10] sm:$0xff]  ;;  %v671_v52 = vld [vmem:[#allocation3] sm:$0xff]  ;;  %v672_v53 = vld [vmem:[#allocation3 + $0x38] sm:$0xff]  ;;  %vm778_vm11 = vcmask 261120   ;;  %vm1086_vm12 = vcmask 130048  }
 0x183   : > { %700 = vperm.xlu0 %1513, %v682_v34   ;;  %690 = vperm.xlu1 %1514, %v680_v35   ;;  %v1883_v46 = vsel %vm831_vm10, %v833_v44, %v836_v45  ;;  %v677_v60 = vld [vmem:[#allocation3 + $0x30] sm:$0xff]  ;;  %v678_v61 = vld [vmem:[#allocation3 + $0x28] sm:$0xff]  ;;  %v674_v63 = vld [vmem:[#allocation3 + $0x18] sm:$0xff]  ;;  %s2276_s15 = sld [smem:[#allocation9_spill]]  ;;  %p1436_p8 = scmp.ne.s32.totalorder %s1608_s17, 2 }
 0x184   : > { %v673_v62 = vld [vmem:[#allocation3 + $0x8] sm:$0xff] }
 0x185   : > { %v1517_v39 = vld [vmem:[%s2261_s8 + $0x4] ss:$8 sps:$4 sm:$0xff]  }
 0x186   : > { %1424 = vmatprep.mubr.msk.bf16.mxu1 %vm1086_vm12, %v1517_v39 }
 0x187   : > { %775 = vperm.xlu0 %1513, %v772_v38  }
 0x189   : > { %v969_v39 = vld [vmem:[%s2276_s15 + $0x98] sm:$0xff] }
 0x18b   : > { %926 = vrot.lane.b32.xlu0 %v1875_v43, %s1637_s19 }
 0x18f   : > { %930 = vrot.lane.b32.xlu0 %v1883_v46, %s1637_s19 }
 0x193   : > { %913 = vrot.lane.b32.xlu0 %v1875_v43, %s1638_s16 }
 0x197   : > { %917 = vrot.lane.b32.xlu0 %v1883_v46, %s1638_s16 }
 0x19b   : > { %900 = vrot.lane.b32.xlu0 %v1875_v43, %s1639_s18 }
 0x19f   : > { %904 = vrot.lane.b32.xlu0 %v1883_v46, %s1639_s18 }
 0x1a3   : > { %887 = vrot.lane.b32.xlu0 %v1875_v43, %s1640_s24 }
 0x1a7   : > { %891 = vrot.lane.b32.xlu0 %v1883_v46, %s1640_s24 }
 0x1ab   : > { %874 = vrot.lane.b32.xlu0 %v1875_v43, %s1641_s9 }
 0x1af   : > { %878 = vrot.lane.b32.xlu0 %v1883_v46, %s1641_s9 }
 0x1b3   : > { %861 = vrot.lane.b32.xlu0 %v1875_v43, %s1642_s20 }
 0x1b7   : > { %865 = vrot.lane.b32.xlu0 %v1883_v46, %s1642_s20 }
 0x1bb   : > { %846 = vrot.lane.b32.xlu0 %v1875_v43, %s1643_s21 }
 0x1bf   : > { %850 = vrot.lane.b32.xlu0 %v1883_v46, %s1643_s21 }
 0x1c3   : > { %939 = vrot.lane.b32.xlu0 %v1875_v43, %s1644_s22 }
 0x1c7   : > { %943 = vrot.lane.b32.xlu0 %v1883_v46, %s1644_s22 }
 0x1cb   : > { %1065 = vperm.xlu0 %1513, %v1047_v47  }
 0x1cf   : > { %1055 = vperm.xlu0 %1513, %v1045_v48  }
 0x1d3   : > { %1217 = vperm.xlu0 %1513, %v1209_v49  }
 0x1fa   : > { %v696_v54 = vpop.permute.xlu0 %695  ;;  %v686_v55 = vpop.permute.xlu1 %685 }
 0x1fb   : > { %v707_v56 = vadd.f32 %v696_v54, %v675_v50  ;;  %v708_v57 = vadd.f32 %v696_v54, %v676_v51  ;;  %v1920_v58 = vadd.f32 %v686_v55, %v671_v52  ;;  %v1922_v59 = vadd.f32 %v686_v55, %v672_v53 }
 0x1fd   : > { %v1415_v0 = vmul.f32 -1.442695, %v707_v56  ;;  %v1416_v1 = vmul.f32 -1.442695, %v708_v57  ;;  %v1411_v2 = vmul.f32 -1.442695, %v1920_v58 }
 0x1fe   : > { %v1412_v3 = vmul.f32 -1.442695, %v1922_v59  ;;  %v701_v4 = vpop.permute.xlu0 %700  ;;  %v691_v6 = vpop.permute.xlu1 %690 }
 0x1ff   : > { %1522 = vpow2.f32 %v1415_v0  ;;  %v709_v7 = vadd.f32 %v701_v4, %v677_v60  ;;  %v710_v8 = vadd.f32 %v701_v4, %v678_v61  ;;  %v705_v9 = vadd.f32 %v691_v6, %v673_v62 }
 0x200   : > { %1524 = vpow2.f32 %v1416_v1  ;;  %v706_v10 = vadd.f32 %v691_v6, %v674_v63  ;;  %v1208_v1 = vld [vmem:[%s2263_s10] sm:$0xff] }
 0x201   : > { %1526 = vpow2.f32 %v1411_v2  ;;  %v1417_v11 = vmul.f32 -1.442695, %v709_v7  ;;  %v1418_v12 = vmul.f32 -1.442695, %v710_v8  ;;  %v1413_v13 = vmul.f32 -1.442695, %v705_v9 }
 0x202   : > { %1528 = vpow2.f32 %v1412_v3  ;;  %v1414_v14 = vmul.f32 -1.442695, %v706_v10 }
 0x203   : > { %1530 = vpow2.f32 %v1417_v11 }
 0x204   : > { %1532 = vpow2.f32 %v1418_v12 }
 0x205   : > { %1534 = vpow2.f32 %v1413_v13 }
 0x206   : > { %1536 = vpow2.f32 %v1414_v14 }
 0x20c   : > { %v1523_v5 = vpop.eup %1522 }
 0x20d   : > { %v1525_v15 = vpop.eup %1524  ;;  %v739_v16 = vadd.f32 1.0, %v1523_v5  ;;  %v852_v5 = vlaneseq }
 0x20e   : > { %v1527_v17 = vpop.eup %1526  ;;  %v740_v18 = vadd.f32 1.0, %v1525_v15 }
 0x20f   : > { %v1529_v19 = vpop.eup %1528  ;;  %1538 = vrcp.f32 %v739_v16  ;;  %v735_v27 = vadd.f32 1.0, %v1527_v17  ;;  %v1994_v17 = vand.u32 127, %v852_v5  ;;  %v966_v5 = vld [vmem:[%s2276_s15 + $0x80] sm:$0xff] }
 0x210   : > { %v1531_v20 = vpop.eup %1530  ;;  %v736_v21 = vadd.f32 1.0, %v1529_v19  ;;  %1540 = vrcp.f32 %v740_v18 }
 0x211   : > { %v1533_v22 = vpop.eup %1532  ;;  %v741_v23 = vadd.f32 1.0, %v1531_v20  ;;  %vm932_vm13 = vcmp.lt.s32.totalorder %v1994_v17, 112  ;;  %vm919_vm14 = vcmp.lt.s32.totalorder %v1994_v17, 113  ;;  %vm906_vm15 = vcmp.lt.s32.totalorder %v1994_v17, 127 }
 0x212   : > { %v1535_v24 = vpop.eup %1534  ;;  %1542 = vrcp.f32 %v736_v21  ;;  %v742_v25 = vadd.f32 1.0, %v1533_v22  ;;  %v980_v21 = vld [vmem:[%s2276_s15 + $0xf0] sm:$0xff]  ;;  %vm893_vm0 = vcmp.lt.s32.totalorder %v1994_v17, 1  ;;  %vm880_vm1 = vcmp.lt.s32.totalorder %v1994_v17, 15 }
 0x213   : > { %v1537_v26 = vpop.eup %1536  ;;  %1544 = vrcp.f32 %v741_v23  ;;  %v737_v28 = vadd.f32 1.0, %v1535_v24  ;;  %v978_v24 = vld [vmem:[%s2276_s15 + $0xe0] sm:$0xff]  ;;  %vm867_vm2 = vcmp.lt.s32.totalorder %v1994_v17, 16  ;;  %vm854_vm3 = vcmp.lt.s32.totalorder %v1994_v17, 17 }
 0x214   : > { %1546 = vrcp.f32 %v742_v25  ;;  %v738_v29 = vadd.f32 1.0, %v1537_v26  ;;  %v979_v25 = vld [vmem:[%s2276_s15 + $0xe8] sm:$0xff]  ;;  %v981_v26 = vld [vmem:[%s2276_s15 + $0xf8] sm:$0xff]  ;;  %vm945_vm4 = vcmp.lt.s32.totalorder %v1994_v17, 111 }
 0x215   : > { %1548 = vrcp.f32 %v737_v28  ;;  %v1520_v17 = vld [vmem:[%s2261_s8 + $0x10] ss:$8 sps:$4 sm:$0xff]  }
 0x216   : > { %1550 = vrcp.f32 %v738_v29 }
 0x217   : > { %1552 = vrcp.f32 %v735_v27 }
 0x21c   : > { %v1539_v30 = vpop.eup %1538 }
 0x21d   : > { %v1541_v31 = vpop.eup %1540  ;;  %v763_v37 = vmul.f32 %v1539_v30, %v707_v56  ;;  %v767_v56 = vld [vmem:[%s2259_s6] sm:$0x3] }
 0x21e   : > { %v764_v42 = vmul.f32 %v1541_v31, %v708_v57  ;;  %v776_v57 = vpop.permute.xlu0 %775 }
 0x21f   : > { %v1543_v32 = vpop.eup %1542 }
 0x220   : > { %v1545_v34 = vpop.eup %1544  ;;  %v760_v50 = vmul.f32 %v1543_v32, %v1922_v59 }
 0x221   : > { %v1547_v35 = vpop.eup %1546  ;;  %v765_v38 = vmul.f32 %v1545_v34, %v709_v7  ;;  %v976_v34 = vld [vmem:[%s2276_s15 + $0xd0] sm:$0xff] }
 0x222   : > { %v1549_v41 = vpop.eup %1548  ;;  %v766_v45 = vmul.f32 %v1547_v35, %v710_v8  ;;  %v927_v2 = vpop.permute.xlu0 %926  ;;  %v977_v35 = vld [vmem:[%s2276_s15 + $0xd8] sm:$0xff] }
 0x223   : > { %v1551_v47 = vpop.eup %1550  ;;  %v770_v48 = vpack.c.bf16 %v765_v38, %v763_v37  ;;  %v761_v53 = vmul.f32 %v1549_v41, %v705_v9 }
 0x224   : > { %v1553_v49 = vpop.eup %1552  ;;  %v762_v51 = vmul.f32 %v1551_v47, %v706_v10  ;;  %v771_v52 = vpack.c.bf16 %v766_v45, %v764_v42  ;;  %v974_v45 = vld [vmem:[%s2276_s15 + $0xc0] sm:$0xff]  ;;  %v975_v47 = vld [vmem:[%s2276_s15 + $0xc8] sm:$0xff] }
 0x225   : > { %v759_v55 = vmul.f32 %v1553_v49, %v1920_v58 }
 0x226   : > { %794 = vmatprep.subr.bf16.mxu0 %v771_v52  ;;  %v769_v54 = vpack.c.bf16 %v762_v51, %v760_v50  ;;  %v931_v3 = vpop.permute.xlu0 %930 }
 0x227   : > { %795 = vmatpush1.bf16.msra.mxu0 %v770_v48  ;;  %v768_v60 = vpack.c.bf16 %v761_v53, %v759_v55  ;;  %v934_v22 = vsel %vm932_vm13, %v927_v2, %v931_v3  ;;  %v936_v23 = vsel %vm932_vm13, %v931_v3, %v927_v2  ;;  %v972_v55 = vld [vmem:[%s2276_s15 + $0xb0] sm:$0xff] }
 0x228   : > { %796 = vmatprep.subr.bf16.mxu0 %v769_v54  ;;  %v1016_v29 = vmul.f32 %v980_v21, %v934_v22  ;;  %v1017_v42 = vmul.f32 %v981_v26, %v936_v23  ;;  %v968_v21 = vld [vmem:[%s2276_s15 + $0x90] sm:$0xff] }
 0x22a   : > { %v914_v4 = vpop.permute.xlu0 %913 }
 0x22b   : > { %797 = vmatpush1.bf16.msra.mxu0 %v768_v60  ;;  %v973_v60 = vld [vmem:[%s2276_s15 + $0xb8] sm:$0xff] }
 0x22e   : > { %1419 = vmatmul.mubr.msk.bf16.vlgmr.msra.gmra.mxu0 %vm778_vm11, %v767_v56  ;;  %v918_v6 = vpop.permute.xlu0 %917 }
 0x22f   : > { %1260 = vmatprep.mubr.bf16.mxu0 %v1636_v33  ;;  %v921_v30 = vsel %vm919_vm14, %v914_v4, %v918_v6  ;;  %v923_v37 = vsel %vm919_vm14, %v918_v6, %v914_v4 }
 0x230   : > { %v1012_v51 = vmul.f32 %v976_v34, %v921_v30  ;;  %v1013_v52 = vmul.f32 %v977_v35, %v923_v37  ;;  %v963_v30 = vld [vmem:[%s2276_s15 + $0x68] sm:$0xff]  ;;  %v960_v37 = vld [vmem:[%s2276_s15 + $0x50] sm:$0xff] }
 0x232   : > { %v901_v7 = vpop.permute.xlu0 %900 }
 0x236   : > { %v905_v8 = vpop.permute.xlu0 %904 }
 0x237   : > { %v908_v56 = vsel %vm906_vm15, %v901_v7, %v905_v8 }
 0x238   : > { %v1008_v2 = vmul.f32 %v972_v55, %v908_v56  ;;  %v956_v55 = vld [vmem:[%s2276_s15 + $0x30] sm:$0xff] }
 0x23a   : > { %v1984_v10 = vpop.permute.xlu0 %887 }
 0x23e   : > { %v1986_v13 = vpop.permute.xlu0 %891 }
 0x242   : > { %v1990_v15 = vpop.permute.xlu0 %874 }
 0x246   : > { %v1998_v19 = vpop.permute.xlu0 %878 }
 0x24a   : > { %v2016_v27 = vpop.permute.xlu0 %861 }
 0x2ee   : > { %v816_v59 = vpop.f32.mrf.mxu0 }
 0x2ef   : > { %v817_v61 = vadd.f32 %v816_v59, %v776_v57  ;;  %v2049_v59 = vpop.permute.xlu0 %865 }
 0x2f0   : > { %v818_v62 = vpop.f32.mrf.mxu0 }
 0x2f1   : > { %v1936_v58 = vsel %vm831_vm10, %v817_v61, %v832_v40  ;;  %v819_v33 = vadd.f32 %v818_v62, %v776_v57  ;;  %v1046_v40 = vld [vmem:[%s1755_s4 + $0x10] sm:$0xff]  ;;  %v910_v57 = vsel %vm906_vm15, %v905_v8, %v901_v7 }
 0x2f2   : > { %v820_v63 = vpop.f32.mrf.mxu0  ;;  %924 = vrot.lane.b32.xlu1 %v1936_v58, %s1637_s19  ;;  %v1009_v3 = vmul.f32 %v973_v60, %v910_v57  ;;  %v957_v57 = vld [vmem:[%s2276_s15 + $0x38] sm:$0xff] }
 0x2f3   : > { %v1955_v36 = vsel %vm831_vm10, %v819_v33, %v833_v44  ;;  %v1044_v44 = vld [vmem:[%s1755_s4] sm:$0xff]  ;;  %v967_v63 = vld [vmem:[%s2276_s15 + $0x88] sm:$0xff]  ;;  %v2076_v22 = vpop.permute.xlu0 %846 }
 0x2f4   : > { %v821_v0 = vpop.f32.mrf.mxu0  ;;  %v971_v33 = vld [vmem:[%s2276_s15 + $0xa8] sm:$0xff] }
 0x2f5   : > { %v970_v0 = vld [vmem:[%s2276_s15 + $0xa0] sm:$0xff] }
 0x2f6   : > { %911 = vrot.lane.b32.xlu1 %v1936_v58, %s1638_s16 }
 0x2fa   : > { %898 = vrot.lane.b32.xlu1 %v1936_v58, %s1639_s18 }
 0x2fe   : > { %885 = vrot.lane.b32.xlu1 %v1936_v58, %s1640_s24 }
 0x302   : > { %872 = vrot.lane.b32.xlu1 %v1936_v58, %s1641_s9 }
 0x306   : > { %859 = vrot.lane.b32.xlu1 %v1936_v58, %s1642_s20 }
 0x30a   : > { %844 = vrot.lane.b32.xlu1 %v1936_v58, %s1643_s21 }
 0x30e   : > { %928 = vrot.lane.b32.xlu1 %v1955_v36, %s1637_s19 }
 0x312   : > { %915 = vrot.lane.b32.xlu1 %v1955_v36, %s1638_s16 }
 0x316   : > { %902 = vrot.lane.b32.xlu1 %v1955_v36, %s1639_s18 }
 0x31a   : > { %937 = vrot.lane.b32.xlu1 %v1936_v58, %s1644_s22 }
 0x31e   : > { %889 = vrot.lane.b32.xlu1 %v1955_v36, %s1640_s24 }
 0x322   : > { %876 = vrot.lane.b32.xlu1 %v1955_v36, %s1641_s9 }
 0x326   : > { %863 = vrot.lane.b32.xlu1 %v1955_v36, %s1642_s20 }
 0x32a   : > { %848 = vrot.lane.b32.xlu1 %v1955_v36, %s1643_s21  ;;  %s2277_s21 = sld [smem:[#allocation10_spill]] }
 0x32e   : > { %941 = vrot.lane.b32.xlu1 %v1955_v36, %s1644_s22 }
 0x332   : > { %1060 = vperm.xlu1 %1514, %v1046_v40  }
 0x336   : > { %1050 = vperm.xlu1 %1514, %v1044_v44  }
 0x33a   : > { %1212 = vperm.xlu1 %1514, %v1208_v1  }
 0x364   : > { %v925_v9 = vpop.permute.xlu1 %924 }
 0x368   : > { %v912_v11 = vpop.permute.xlu1 %911 }
 0x36c   : > { %v899_v12 = vpop.permute.xlu1 %898 }
 0x370   : > { %v1988_v14 = vpop.permute.xlu1 %885 }
 0x374   : > { %v1992_v16 = vpop.permute.xlu1 %872 }
 0x378   : > { %v1996_v18 = vpop.permute.xlu1 %859 }
 0x37c   : > { %v2001_v20 = vpop.permute.xlu1 %844 }
 0x380   : > { %v929_v28 = vpop.permute.xlu1 %928 }
 0x381   : > { %v933_v31 = vsel %vm932_vm13, %v925_v9, %v929_v28  ;;  %v935_v32 = vsel %vm932_vm13, %v929_v28, %v925_v9  ;;  %v1003_v9 = vmul.f32 %v967_v63, %v1955_v36  ;;  %v1002_v36 = vmul.f32 %v966_v5, %v1936_v58  ;;  %v965_v28 = vld [vmem:[%s2276_s15 + $0x78] sm:$0xff]  ;;  %v962_v58 = vld [vmem:[%s2276_s15 + $0x60] sm:$0xff]  ;;  %v955_v63 = vld [vmem:[%s2276_s15 + $0x28] sm:$0xff] }
 0x382   : > { %v1014_v38 = vmul.f32 %v978_v24, %v933_v31  ;;  %v1015_v41 = vmul.f32 %v979_v25, %v935_v32  ;;  %v964_v25 = vld [vmem:[%s2276_s15 + $0x70] sm:$0xff] }
 0x384   : > { %v916_v48 = vpop.permute.xlu1 %915  ;;  %v1037_v49 = vpack.c.bf16 %v1017_v42, %v1015_v41  ;;  %v1036_v50 = vpack.c.bf16 %v1016_v29, %v1014_v38  ;;  %v895_v29 = vsel %vm893_vm0, %v1984_v10, %v1986_v13  ;;  %v851_v38 = vpop.permute.xlu0 %850 }
 0x385   : > { %v920_v53 = vsel %vm919_vm14, %v912_v11, %v916_v48  ;;  %v922_v54 = vsel %vm919_vm14, %v916_v48, %v912_v11  ;;  %v1005_v11 = vmul.f32 %v969_v39, %v1883_v46  ;;  %v1004_v46 = vmul.f32 %v968_v21, %v1875_v43  ;;  %v958_v48 = vld [vmem:[%s2276_s15 + $0x40] sm:$0xff] }
 0x386   : > { %v1010_v61 = vmul.f32 %v974_v45, %v920_v53  ;;  %v1011_v62 = vmul.f32 %v975_v47, %v922_v54  ;;  %1093 = vmatprep.subr.bf16.mxu1 %v1037_v49  ;;  %v897_v43 = vsel %vm893_vm0, %v1986_v13, %v1984_v10  ;;  %v1001_v35 = vmul.f32 %v965_v28, %v895_v29  ;;  %v961_v45 = vld [vmem:[%s2276_s15 + $0x58] sm:$0xff]  ;;  %v959_v49 = vld [vmem:[%s2276_s15 + $0x48] sm:$0xff] }
 0x387   : > { %1094 = vmatpush1.bf16.msra.mxu1 %v1036_v50  ;;  %v1031_v26 = vpack.c.bf16 %v1005_v11, %v1003_v9  ;;  %v1030_v13 = vpack.c.bf16 %v1004_v46, %v1002_v36  ;;  %v1000_v34 = vmul.f32 %v964_v25, %v897_v43  ;;  %v882_v47 = vsel %vm880_vm1, %v1990_v15, %v1998_v19  ;;  %v951_v9 = vld [vmem:[%s2276_s15 + $0x8] sm:$0xff]  ;;  %v984_v46 = vld [vmem:[%s2276_s15 + $0x110] sm:$0xff]  ;;  %v985_v29 = vld [vmem:[%s2276_s15 + $0x118] sm:$0xff] }
 0x388   : > { %v903_v40 = vpop.permute.xlu1 %902  ;;  %v1035_v44 = vpack.c.bf16 %v1013_v52, %v1011_v62  ;;  %v1034_v1 = vpack.c.bf16 %v1012_v51, %v1010_v61  ;;  %v997_v54 = vmul.f32 %v961_v45, %v882_v47  ;;  %v869_v61 = vsel %vm867_vm2, %v2016_v27, %v2049_v59  ;;  %v954_v62 = vld [vmem:[%s2276_s15 + $0x20] sm:$0xff] }
 0x389   : > { %v907_v4 = vsel %vm906_vm15, %v899_v12, %v903_v40  ;;  %v909_v6 = vsel %vm906_vm15, %v903_v40, %v899_v12  ;;  %v1515_v47 = vld [vmem:[%s2261_s8] ss:$8 sps:$4 sm:$0xff]  }
 0x38a   : > { %v1006_v7 = vmul.f32 %v970_v0, %v907_v4  ;;  %v1007_v8 = vmul.f32 %v971_v33, %v909_v6  ;;  %1095 = vmatprep.subr.bf16.mxu1 %v1035_v44  ;;  %v940_v0 = vpop.permute.xlu0 %939  ;;  %v953_v6 = vld [vmem:[%s2276_s15 + $0x18] sm:$0xff] }
 0x38b   : > { %1096 = vmatpush1.bf16.msra.mxu1 %v1034_v1  ;;  %v993_v1 = vmul.f32 %v957_v57, %v869_v61 }
 0x38c   : > { %v2078_v12 = vpop.permute.xlu1 %937  ;;  %v1033_v23 = vpack.c.bf16 %v1009_v3, %v1007_v8  ;;  %v1032_v24 = vpack.c.bf16 %v1008_v2, %v1006_v7  ;;  %v952_v2 = vld [vmem:[%s2276_s15 + $0x10] sm:$0xff]  ;;  %v856_v7 = vsel %vm854_vm3, %v2076_v22, %v851_v38  ;;  %v950_v8 = vld [vmem:[%s2276_s15] sm:$0xff] }
 0x38d   : > { %v989_v36 = vmul.f32 %v953_v6, %v856_v7 }
 0x38e   : > { %1097 = vmatprep.subr.bf16.mxu1 %v1033_v23  ;;  %v944_v25 = vpop.permute.xlu0 %943 }
 0x38f   : > { %1098 = vmatpush1.bf16.msra.mxu1 %v1032_v24  ;;  %v947_v43 = vsel %vm945_vm4, %v940_v0, %v944_v25 }
 0x390   : > { %1099 = vmatprep.subr.bf16.mxu1 %v1031_v26  ;;  %v890_v31 = vpop.permute.xlu1 %889 }
 0x391   : > { %v894_v32 = vsel %vm893_vm0, %v1988_v14, %v890_v31  ;;  %v896_v10 = vsel %vm893_vm0, %v890_v31, %v1988_v14  ;;  %v884_v14 = vsel %vm880_vm1, %v1998_v19, %v1990_v15 }
 0x392   : > { %v998_v41 = vmul.f32 %v962_v58, %v896_v10  ;;  %v999_v42 = vmul.f32 %v963_v30, %v894_v32  ;;  %v996_v19 = vmul.f32 %v960_v37, %v884_v14  ;;  %v982_v58 = vld [vmem:[%s2276_s15 + $0x100] sm:$0xff]  ;;  %v983_v30 = vld [vmem:[%s2276_s15 + $0x108] sm:$0xff]  ;;  %v1518_v14 = vld [vmem:[%s2261_s8 + $0x14] ss:$8 sps:$4 sm:$0xff]  }
 0x393   : > { %1100 = vmatpush1.bf16.msra.mxu1 %v1030_v13 }
 0x394   : > { %v877_v50 = vpop.permute.xlu1 %876  ;;  %v1029_v51 = vpack.c.bf16 %v1001_v35, %v999_v42  ;;  %v1028_v52 = vpack.c.bf16 %v1000_v34, %v998_v41  ;;  %v1020_v35 = vmul.f32 %v984_v46, %v947_v43 }
 0x395   : > { %v881_v53 = vsel %vm880_vm1, %v1992_v16, %v877_v50  ;;  %v883_v15 = vsel %vm880_vm1, %v877_v50, %v1992_v16  ;;  %v871_v16 = vsel %vm867_vm2, %v2049_v59, %v2016_v27 }
 0x396   : > { %v994_v60 = vmul.f32 %v958_v48, %v883_v15  ;;  %v995_v56 = vmul.f32 %v959_v49, %v881_v53  ;;  %1101 = vmatprep.subr.bf16.mxu1 %v1029_v51  ;;  %v992_v59 = vmul.f32 %v956_v55, %v871_v16  ;;  %v1066_v48 = vpop.permute.xlu0 %1065 }
 0x397   : > { %1102 = vmatpush1.bf16.msra.mxu1 %v1028_v52 }
 0x398   : > { %v864_v33 = vpop.permute.xlu1 %863  ;;  %v1027_v39 = vpack.c.bf16 %v997_v54, %v995_v56  ;;  %v1026_v40 = vpack.c.bf16 %v996_v19, %v994_v60 }
 0x399   : > { %v868_v44 = vsel %vm867_vm2, %v1996_v18, %v864_v33  ;;  %v870_v27 = vsel %vm867_vm2, %v864_v33, %v1996_v18  ;;  %v858_v18 = vsel %vm854_vm3, %v851_v38, %v2076_v22 }
 0x39a   : > { %v990_v3 = vmul.f32 %v954_v62, %v870_v27  ;;  %v991_v4 = vmul.f32 %v955_v63, %v868_v44  ;;  %1103 = vmatprep.subr.bf16.mxu1 %v1027_v39  ;;  %v988_v24 = vmul.f32 %v952_v2, %v858_v18  ;;  %v1056_v15 = vpop.permute.xlu0 %1055 }
 0x39b   : > { %1104 = vmatpush1.bf16.msra.mxu1 %v1026_v40 }
 0x39c   : > { %v849_v11 = vpop.permute.xlu1 %848  ;;  %v1025_v5 = vpack.c.bf16 %v993_v1, %v991_v4  ;;  %v1024_v21 = vpack.c.bf16 %v992_v59, %v990_v3 }
 0x39d   : > { %v855_v23 = vsel %vm854_vm3, %v2001_v20, %v849_v11  ;;  %v857_v22 = vsel %vm854_vm3, %v849_v11, %v2001_v20  ;;  %v949_v20 = vsel %vm945_vm4, %v944_v25, %v940_v0 }
 0x39e   : > { %v986_v26 = vmul.f32 %v950_v8, %v857_v22  ;;  %v987_v28 = vmul.f32 %v951_v9, %v855_v23  ;;  %1105 = vmatprep.subr.bf16.mxu1 %v1025_v5  ;;  %v1021_v37 = vmul.f32 %v985_v29, %v949_v20 }
 0x39f   : > { %1106 = vmatpush1.bf16.msra.mxu1 %v1024_v21 }
 0x3a0   : > { %v942_v31 = vpop.permute.xlu1 %941  ;;  %v1023_v32 = vpack.c.bf16 %v989_v36, %v987_v28  ;;  %v1022_v10 = vpack.c.bf16 %v988_v24, %v986_v26 }
 0x3a1   : > { %v946_v13 = vsel %vm945_vm4, %v2078_v12, %v942_v31  ;;  %v948_v34 = vsel %vm945_vm4, %v942_v31, %v2078_v12 }
 0x3a2   : > { %v1018_v38 = vmul.f32 %v982_v58, %v946_v13  ;;  %v1019_v41 = vmul.f32 %v983_v30, %v948_v34  ;;  %1107 = vmatprep.subr.bf16.mxu1 %v1023_v32 }
 0x3a3   : > { %1108 = vmatpush1.bf16.msra.mxu1 %v1022_v10 }
 0x3a4   : > { %v1039_v42 = vpack.c.bf16 %v1021_v37, %v1019_v41  ;;  %v1038_v45 = vpack.c.bf16 %v1020_v35, %v1018_v38 }
 0x3a6   : > { %1123 = vmatprep.subr.bf16.mxu1 %v1039_v42 }
 0x3a7   : > { %1124 = vmatpush2.bf16.msra.mxu1 %v1038_v45 }
 0x3aa   : > { %1126 = vmatmul.mubr.bf16.vlgmr.msra.gmra.mxu1 %v1515_v47 }
 0x3ab   : > { %1425 = vmatprep.mubr.msk.bf16.mxu1 %vm1086_vm12, %v1518_v14 }
 0x3ad   : > { %v1061_v12 = vpop.permute.xlu1 %1060 }
 0x3b1   : > { %v1051_v50 = vpop.permute.xlu1 %1050 }
 0x3b2   : > { %1136 = vmatmul.mubr.bf16.gmra.mxu1 %v1520_v17 }
 0x46a   : > { %v1127_v49 = vpop.f32.mrf.mxu1 }
 0x46b   : > { %v2225_v16 = vadd.f32 %v1127_v49, %v1051_v50 }
 0x46c   : > { %v1129_v51 = vpop.f32.mrf.mxu1 }
 0x46d   : > { %v2220_v52 = vadd.f32 %v1129_v51, %v1051_v50  ;;  %v1426_v27 = vmul.f32 -1.442695, %v2225_v16 }
 0x46e   : > { %v1131_v53 = vpop.f32.mrf.mxu1 }
 0x46f   : > { %v1427_v19 = vmul.f32 -1.442695, %v2220_v52  ;;  %v2223_v60 = vadd.f32 %v1131_v53, %v1056_v15  ;;  %v1218_v53 = vpop.permute.xlu0 %1217 }
 0x470   : > { %v1133_v54 = vpop.f32.mrf.mxu1 }
 0x471   : > { %v1134_v55 = vadd.f32 %v1133_v54, %v1056_v15  ;;  %1554 = vpow2.f32 %v1427_v19  ;;  %v1428_v33 = vmul.f32 -1.442695, %v2223_v60 }
 0x472   : > { %v1137_v56 = vpop.f32.mrf.mxu1 }
 0x473   : > { %v1429_v57 = vmul.f32 -1.442695, %v1134_v55  ;;  %v1138_v61 = vadd.f32 %v1137_v56, %v1061_v12 }
 0x474   : > { %v1139_v62 = vpop.f32.mrf.mxu1 }
 0x475   : > { %1556 = vpow2.f32 %v1429_v57  ;;  %v1430_v63 = vmul.f32 -1.442695, %v1138_v61  ;;  %v1140_v0 = vadd.f32 %v1139_v62, %v1061_v12  ;;  %v1521_v12 = vld [vmem:[%s2277_s21] sm:$0x7f]  }
 0x476   : > { %v1141_v39 = vpop.f32.mrf.mxu1 }
 0x477   : > { %v1431_v40 = vmul.f32 -1.442695, %v1140_v0  ;;  %v1142_v44 = vadd.f32 %v1141_v39, %v1066_v48  ;;  %1558 = vpow2.f32 %v1430_v63 }
 0x478   : > { %v1143_v59 = vpop.f32.mrf.mxu1 }
 0x479   : > { %1560 = vpow2.f32 %v1431_v40  ;;  %v1432_v1 = vmul.f32 -1.442695, %v1142_v44  ;;  %v1144_v2 = vadd.f32 %v1143_v59, %v1066_v48  ;;  %v1213_v48 = vpop.permute.xlu1 %1212 }
 0x47a   : > { %1562 = vpow2.f32 %v1428_v33 }
 0x47b   : > { %1564 = vpow2.f32 %v1432_v1  ;;  %v1433_v3 = vmul.f32 -1.442695, %v1144_v2 }
 0x47c   : > { %1566 = vpow2.f32 %v1426_v27 }
 0x47d   : > { %1568 = vpow2.f32 %v1433_v3 }
 0x47e   : > { %v1555_v4 = vpop.eup %1554 }
 0x47f   : > { %v1171_v7 = vadd.f32 1.0, %v1555_v4 }
 0x481   : > { %1570 = vrcp.f32 %v1171_v7 }
 0x482   : > { %v1557_v6 = vpop.eup %1556 }
 0x483   : > { %v1173_v8 = vadd.f32 1.0, %v1557_v6 }
 0x484   : > { %v1559_v18 = vpop.eup %1558 }
 0x485   : > { %v1174_v23 = vadd.f32 1.0, %v1559_v18  ;;  %1572 = vrcp.f32 %v1173_v8 }
 0x486   : > { %v1561_v9 = vpop.eup %1560 }
 0x487   : > { %v1563_v11 = vpop.eup %1562  ;;  %v1175_v5 = vadd.f32 1.0, %v1561_v9 }
 0x488   : > { %v1565_v21 = vpop.eup %1564  ;;  %v1172_v46 = vadd.f32 1.0, %v1563_v11 }
 0x489   : > { %v1567_v22 = vpop.eup %1566  ;;  %v1176_v24 = vadd.f32 1.0, %v1565_v21  ;;  %1574 = vrcp.f32 %v1175_v5 }
 0x48a   : > { %v1569_v36 = vpop.eup %1568  ;;  %v1170_v26 = vadd.f32 1.0, %v1567_v22 }
 0x48b   : > { %1576 = vrcp.f32 %v1176_v24  ;;  %v1177_v25 = vadd.f32 1.0, %v1569_v36 }
 0x48c   : > { %1578 = vrcp.f32 %v1174_v23 }
 0x48d   : > { %1580 = vrcp.f32 %v1177_v25 }
 0x48e   : > { %1582 = vrcp.f32 %v1172_v46  ;;  %v1571_v28 = vpop.eup %1570 }
 0x48f   : > { %1584 = vrcp.f32 %v1170_v26  ;;  %v1195_v38 = vmul.f32 %v1571_v28, %v2220_v52 }
 0x492   : > { %v1573_v29 = vpop.eup %1572 }
 0x493   : > { %v1197_v10 = vmul.f32 %v1573_v29, %v1134_v55 }
 0x495   : > { %v1205_v47 = vpack.c.bf16 %v1197_v10, %v1195_v38 }
 0x496   : > { %v1575_v43 = vpop.eup %1574 }
 0x497   : > { %v1199_v13 = vmul.f32 %v1575_v43, %v1140_v0 }
 0x498   : > { %v1577_v20 = vpop.eup %1576 }
 0x499   : > { %v1579_v58 = vpop.eup %1578  ;;  %v1200_v31 = vmul.f32 %v1577_v20, %v1142_v44 }
 0x49a   : > { %v1581_v30 = vpop.eup %1580  ;;  %v1198_v35 = vmul.f32 %v1579_v58, %v1138_v61 }
 0x49b   : > { %v1583_v32 = vpop.eup %1582  ;;  %v1201_v34 = vmul.f32 %v1581_v30, %v1144_v2 }
 0x49c   : > { %v1585_v37 = vpop.eup %1584  ;;  %v1196_v42 = vmul.f32 %v1583_v32, %v2223_v60  ;;  %v1206_v45 = vpack.c.bf16 %v1200_v31, %v1198_v35 }
 0x49d   : > { %v1207_v41 = vpack.c.bf16 %v1201_v34, %v1199_v13  ;;  %v1194_v14 = vmul.f32 %v1585_v37, %v2225_v16 }
 0x49f   : > { %1240 = vmatprep.subr.bf16.mxu0 %v1207_v41  ;;  %v1204_v17 = vpack.c.bf16 %v1196_v42, %v1194_v14 }
 0x4a0   : > { %1241 = vmatpush1.bf16.msra.mxu0 %v1206_v45 }
 0x4a1   : > { %1242 = vmatprep.subr.bf16.mxu0 %v1205_v47 }
 0x4a4   : > { %1243 = vmatpush1.bf16.msra.mxu0 %v1204_v17 }
 0x4a7   : > { %1435 = vmatmul.mubr.msk.bf16.vlgmr.msra.gmra.mxu0 %vm778_vm11, %v1521_v12 }
 0x567   : > { %v1262_v49 = vpop.f32.mrf.mxu0 }
 0x568   : > { %v1263_v50 = vadd.f32 %v1262_v49, %v1213_v48 }
 0x569   : > { %v1264_v51 = vpop.f32.mrf.mxu0 }
 0x56a   : > { %1271 = vst [vmem:[#allocation2 + $0x10] sm:$0xff] %v1263_v50  ;;  %v1265_v52 = vadd.f32 %v1264_v51, %v1213_v48 }
 0x56b   : > { %v1266_v15 = vpop.f32.mrf.mxu0 }
 0x56c   : > { %1272 = vst [vmem:[#allocation2] sm:$0xff] %v1265_v52  ;;  %v1267_v19 = vadd.f32 %v1266_v15, %v1218_v53  ;;  %1278 = sbr.rel (%p1436_p8) target bundleno = 1396 (0x574), region = 72 }
 0x56d   : > { %v1268_v54 = vpop.f32.mrf.mxu0 }
 0x56e   : > { %1273 = vst [vmem:[#allocation2 + $0x18] sm:$0x1f] %v1267_v19  ;;  %v1269_v55 = vadd.f32 %v1268_v54, %v1218_v53 }
 0x570   : > { %1274 = vst [vmem:[#allocation2 + $0x8] sm:$0x1f] %v1269_v55 }
 0x571   : > { %v1281_v60 = vcombine.low %v1263_v50, %v1265_v52 }
 0x573   : > { %1283 = vst [vmem:[%s1745_s23] sm:$0x77] %v1281_v60 }
 0x574 PF: > { %s2278_s22 = sld [smem:[#allocation6_spill]] }
 0x575   : > { %s2279_s17 = sld [smem:[#allocation4_spill]] }
 0x576   : > { %s2280_s18 = sld [smem:[#allocation5_spill]] }
 0x577   : > { %s2281_s19 = sld [smem:[#allocation7_spill]] }
 0x578   : > { %s2282_s20 = sld [smem:[#allocation8_spill]] }
 0x57a   : > { %s21_s21 = sadd.s32 1, %s2278_s22  }
 0x57b   : > { %p18_p9 = scmp.ge.s32.totalorder %s21_s21, 8  }
 0x57d   :  { %20 = sbr.rel (!%p18_p9) target bundleno = 4 (0x4), region = 108 }

</bundles_post_ra>
